<compile_context>
chip_gen: v7x
topology: tpu7x:2x2x1
jax: 0.10.0
libtpu: 0.0.40
codegen_flags: <defaults>
</compile_context>

<pallas_src>
import functools

import jax
import jax.numpy as jnp
from jax.experimental import pallas as pl
from jax.experimental.pallas import tpu as pltpu


def _round_up(x, m):
    return ((x + m - 1) // m) * m


# ----------------------------- Pallas kernel --------------------------------
def gather_kernel(ids_ref, table_ref, o_ref):
    """Gather tile_m rows of the fused (embed @ W' + c') table.

    ids_ref:   (tile_m, 1)  int32 token ids for this row tile.
    table_ref: (n_vocab_pad, Np) f32 fused table, VMEM-resident
               (constant index_map -> not re-DMA'd per step).
    o_ref:     (tile_m, Np) output tile (lane-dense -> unmasked stores).

    Gather as a one-hot matmul on the MXU: onehot[i, k] = (ids[i] == k),
    out = onehot @ table == table[ids].  With f32 operands this is exact
    (each output element is one table value plus exact zeros).
    """
    n_vocab = table_ref.shape[0]
    lane_ids = jax.lax.broadcasted_iota(jnp.int32, (1, n_vocab), 1)
    onehot = (ids_ref[...] == lane_ids).astype(table_ref.dtype)
    o_ref[...] = jnp.dot(onehot, table_ref[...],
                         preferred_element_type=jnp.float32).astype(o_ref.dtype)


def table_gather(ids_flat, table, *, tile_m=256, out_dtype=jnp.float32):
    """ids_flat: (N,) int32.  table: (n_vocab_pad, Np).  Returns (N_pad, Np)."""
    n = ids_flat.shape[0]
    n_vocab_pad, np_ = table.shape

    # Clip the row tile to the problem size (sublane multiple of 8).
    tile_m = max(8, min(tile_m, _round_up(n, 8)))
    n_pad = _round_up(n, tile_m)

    ids2 = ids_flat.astype(jnp.int32).reshape(n, 1)
    if n_pad != n:
        # Padded ids = 0 (a valid row); the extra output rows are sliced off.
        ids2 = jnp.pad(ids2, ((0, n_pad - n), (0, 0)))

    out_bytes = jnp.dtype(out_dtype).itemsize
    grid = (n_pad // tile_m,)
    return pl.pallas_call(
        gather_kernel,
        out_shape=jax.ShapeDtypeStruct((n_pad, np_), out_dtype),
        grid_spec=pl.GridSpec(
            grid=grid,
            in_specs=[
                pl.BlockSpec((tile_m, 1), lambda i: (i, 0)),        # ids tile
                pl.BlockSpec((n_vocab_pad, np_), lambda i: (0, 0)), # table resident
            ],
            out_specs=pl.BlockSpec((tile_m, np_), lambda i: (i, 0)),
        ),
        compiler_params=pltpu.CompilerParams(
            dimension_semantics=("parallel",)),
        cost_estimate=pl.CostEstimate(
            flops=2 * n_pad * n_vocab_pad * np_,
            transcendentals=0,
            bytes_accessed=(n_pad * 4
                            + n_vocab_pad * np_ * 4
                            + n_pad * np_ * out_bytes)),
    )(ids2, table)


# ------------------------------ Parser (JAX) ---------------------------------
def init_params(key, n_embed, d_embed, d_proj, eps=1e-5):
    """Deterministically-initialized params mirroring Parser.__init__, with the
    embed/Linear/BN(eval) fold into a single lookup table done once here."""
    k0, k1, k2, k3, k4, k5 = jax.random.split(key, 6)
    embed = jax.random.normal(k0, (n_embed, d_embed), jnp.float32)
    # nn.Linear(d_embed, d_proj): weight (d_proj, d_embed), bias (d_proj,)
    bound = 1.0 / (d_embed ** 0.5)
    w = jax.random.uniform(k1, (d_proj, d_embed), jnp.float32, -bound, bound)
    b = jax.random.uniform(k2, (d_proj,), jnp.float32, -bound, bound)
    # nn.BatchNorm1d(d_proj): affine params + running stats (eval mode)
    gamma = jnp.ones((d_proj,), jnp.float32) \
        + 0.01 * jax.random.normal(k3, (d_proj,), jnp.float32)
    beta = 0.01 * jax.random.normal(k4, (d_proj,), jnp.float32)
    running_mean = 0.1 * jax.random.normal(k5, (d_proj,), jnp.float32)
    running_var = jnp.ones((d_proj,), jnp.float32)

    # Fold BN(eval) into the projection:  y = (x W^T + b)*scale + shift
    scale = gamma / jnp.sqrt(running_var + eps)
    shift = beta - running_mean * scale
    w_fold = w.T * scale[None, :]                     # (d_embed, d_proj)
    c_fold = b * scale + shift                        # (d_proj,)

    # Fold the embedding in too: the eval path is fully linear.
    table_core = jnp.dot(embed, w_fold,
                         precision=jax.lax.Precision.HIGHEST) + c_fold[None, :]

    # Pad vocab rows and output lanes to multiples of 128 (rows never gathered,
    # padded lanes are exact zeros -> safe to consume the padded slab).
    n_vocab_pad = _round_up(n_embed, 128)
    np_ = _round_up(d_proj, 128)
    table = jnp.zeros((n_vocab_pad, np_), jnp.float32)
    table = table.at[:n_embed, :d_proj].set(table_core)

    return {
        # kernel param (pre-folded / pre-padded)
        "table": table,
        # raw params (kept for the reference check)
        "embed": embed, "w": w, "b": b, "gamma": gamma, "beta": beta,
        "mean": running_mean, "var": running_var,
    }


def parser_forward(params, premise_ids, *, tile_m=256, keep_padded_lanes=False):
    """premise_ids: (seq_len, batch) int32 token ids (eval path of Parser)."""
    seq_len, batch = premise_ids.shape
    n = seq_len * batch
    d_proj = params["b"].shape[0]

    y = table_gather(premise_ids.reshape(-1), params["table"], tile_m=tile_m)
    y = y[:n]
    if not keep_padded_lanes:
        # Padded lanes are exact zeros; a downstream consumer could read the
        # lane-padded slab directly and skip this XLA slice.
        y = y[:, :d_proj]
    # Dropout: eval mode -> identity.
    return y.reshape(seq_len, batch, -1)


# ----------------------------------- main ------------------------------------
if __name__ == "__main__":
    n_embed, d_embed, d_proj = 100, 32, 64
    seq_len, batch = 32, 32          # N = 1024 rows -> grid of 4 row tiles

    key = jax.random.PRNGKey(0)
    k_params, k_ids = jax.random.split(key)
    params = init_params(k_params, n_embed, d_embed, d_proj)
    premise_ids = jax.random.randint(k_ids, (seq_len, batch), 0, n_embed,
                                     dtype=jnp.int32)

    forward = jax.jit(functools.partial(parser_forward, tile_m=256))
    out = forward(params, premise_ids)
    out = jax.block_until_ready(out)

    # Reference: pure-JAX f32 embed -> Linear -> BN(eval).
    x = jnp.take(params["embed"], premise_ids, axis=0).reshape(-1, d_embed)
    ref = jnp.dot(x, params["w"].T,
                  precision=jax.lax.Precision.HIGHEST) + params["b"]
    scale = params["gamma"] / jnp.sqrt(params["var"] + 1e-5)
    ref = ref * scale + (params["beta"] - params["mean"] * scale)
    ref = ref.reshape(seq_len, batch, d_proj)

    assert out.shape == (seq_len, batch, d_proj)
    # Tolerance leaves headroom for the in-kernel f32 MXU rounding mode;
    # observed error is at f32-rounding level.
    assert jnp.allclose(out, ref, atol=1e-2, rtol=1e-2), \
        float(jnp.max(jnp.abs(out - ref)))

    print("KERNEL_OK")
</pallas_src>

<mosaic_0001>
module attributes {stable_mosaic.version = 11 : i64} {
  func.func @gather_kernel(%arg0: i32, %arg1: memref<256x1xi32, #tpu.memory_space<vmem>>, %arg2: memref<128x128xf32, #tpu.memory_space<vmem>>, %arg3: memref<256x128xf32, #tpu.memory_space<vmem>>) attributes {dimension_semantics = [#tpu.dimension_semantics<parallel>], iteration_bounds = array<i64: 4>, scalar_prefetch = 0 : i64, scratch_operands = 0 : i64, tpu.core_type = #tpu.core_type<tc>, window_params = [{transform_indices = @transform_0, window_bounds = array<i64: 256, 1>}, {pipeline_mode = #tpu.pipeline_mode<synchronous>, transform_indices = @transform_1, window_bounds = array<i64: 128, 128>}, {transform_indices = @transform_2, window_bounds = array<i64: 256, 128>}]} {
    %0 = tpu.iota {dimensions = array<i32: 1>} : vector<1x128xi32>
    %c0 = arith.constant 0 : index
    %c0_0 = arith.constant 0 : index
    %1 = vector.load %arg1[%c0, %c0_0] : memref<256x1xi32, #tpu.memory_space<vmem>>, vector<256x1xi32>
    %2 = vector.broadcast %1 : vector<256x1xi32> to vector<256x128xi32>
    %3 = vector.broadcast %0 : vector<1x128xi32> to vector<256x128xi32>
    %4 = arith.cmpi eq, %2, %3 : vector<256x128xi32>
    %5 = arith.extui %4 : vector<256x128xi1> to vector<256x128xi32>
    %6 = arith.sitofp %5 : vector<256x128xi32> to vector<256x128xf32>
    %c0_1 = arith.constant 0 : index
    %c0_2 = arith.constant 0 : index
    %7 = vector.load %arg2[%c0_1, %c0_2] : memref<128x128xf32, #tpu.memory_space<vmem>>, vector<128x128xf32>
    %cst = arith.constant dense<0.000000e+00> : vector<256x128xf32>
    %8 = tpu.matmul %6, %7, %cst {dimension_numbers = #tpu.dot_dimension_numbers<[1], [0], [0], [1], [0, 0, 1, 1], [], []>} : vector<256x128xf32>, vector<128x128xf32>, vector<256x128xf32> -> vector<256x128xf32>
    %c0_3 = arith.constant 0 : index
    %c0_4 = arith.constant 0 : index
    %9 = vector.load %arg3[%c0_3, %c0_4] : memref<256x128xf32, #tpu.memory_space<vmem>>, vector<256x128xf32>
    tpu.vector_store %arg3[%c0_3, %c0_4], %8 {strides = array<i32>} : memref<256x128xf32, #tpu.memory_space<vmem>>, vector<256x128xf32>,
    return
  }
  func.func @transform_0(%arg0: i32) -> (i32, i32) {
    %c0_i32 = arith.constant 0 : i32
    %c0_i32_0 = arith.constant 0 : i32
    return %arg0, %c0_i32 : i32, i32
  }
  func.func @transform_1(%arg0: i32) -> (i32, i32) {
    %c0_i32 = arith.constant 0 : i32
    %c0_i32_0 = arith.constant 0 : i32
    %c0_i32_1 = arith.constant 0 : i32
    return %c0_i32, %c0_i32_0 : i32, i32
  }
  func.func @transform_2(%arg0: i32) -> (i32, i32) {
    %c0_i32 = arith.constant 0 : i32
    %c0_i32_0 = arith.constant 0 : i32
    return %arg0, %c0_i32 : i32, i32
  }
}

</mosaic_0001>

<bundles_post_ra>
// kernel: parser_forward.1
= control target key start
LH: loop header
LB: loop body
LE: loop exit
PB: predicated region body
PF: predicated region fallthrough
CT: control target
= control target key end

     0   :  { %7 = vsyncpa [#allocation3], 0  ;;  %s1391_s0 = inlined_call_operand.vmem [shape: s32[1024,1], index: 0, kind: input, shape index: {}]   ;;  %s1392_s1 = inlined_call_operand.vmem [shape: f32[128,128], index: 1, kind: input, shape index: {}]   ;;  %s1393_s2 = inlined_call_operand.hbm [shape: f32[1024,128], index: 2, kind: output, shape index: {}]  }
   0x1   :  { %9 = vsyncpa [#allocation3 + $0x1], 0  ;;  %s1102_s9 = smov 0   ;;  %s1104_s10 = smov 0  }
   0x2   :  { %s1106_s11 = smov 0   ;;  %s1108_s12 = smov 0  }
   0x3 LB: > { %s1123_s13 = sadd.s32 4294967295, %s1080_s12   ;;  %s720_s14 = sadd.s32 4294967294, %s1080_s12   ;;  %s1080_s12 = sphi %s1108_s12, %s1399_s12   ;;  %s1076_s11 = sphi %s1106_s11, %s1398_s11   ;;  %s1072_s10 = sphi %s1104_s10, %s1397_s10   ;;  %s1068_s9 = sphi %s1102_s9, %s1396_s9  }
   0x4   : > { %s1127_s15 = sadd.s32 1, %s1080_s12   ;;  %s69_s16 = sadd.s32 1, %s1076_s11 }
   0x5   : > { %s66_s17 = ssub.s32 %s1080_s12, %s1127_s15  ;;  %p79_p0 = scmp.ne.s32.totalorder %s1076_s11, %s1072_s10 }
   0x6   : > { %p67_p1 = scmp.eq.s32.totalorder %s66_s17, 0  ;;  %p80_p2 = scmp.eq.s32.totalorder %s1123_s13, 3 }
   0x7   : > { %p85_p3 = scmp.ne.s32.totalorder %s1072_s10, %s1068_s9  ;;  %p86_p4 = scmp.eq.s32.totalorder %s720_s14, 3 }
   0x8   : > { %s1138_s18 = scalar_select %p67_p1, %s1076_s11, %s69_s16  }
   0x9   : > { %p1140_p5 = por %p80_p2, %p79_p0  ;;  %p1144_p6 = por %p86_p4, %p85_p3 }
   0xa   : > { %p723_p7 = scmp.ge.s32.totalorder %s1080_s12, 1  ;;  %p116_p8 = scmp.lt.s32.totalorder %s1080_s12, 5 }
   0xc   : > { %p117_p9 = pnand %p723_p7, %p116_p8 }
   0xd   : > { %s725_s21 = sshll.u32 (!%p117_p9), %s1123_s13, 5  ;;  %v371_v0 = vld [vmem:[%s1392_s1] sm:$0xff] (!%p117_p9)  ;;  %v372_v1 = vld [vmem:[%s1392_s1 + $0x8] sm:$0xff] (!%p117_p9)  ;;  %v373_v2 = vld [vmem:[%s1392_s1 + $0x10] sm:$0xff] (!%p117_p9)  ;;  %v1082_v3 = vmov (!%p117_p9), 0   ;;  %v145_v57 = vlaneseq (!%p117_p9)  ;;  %v1083_v61 = vmov (!%p117_p9), 1.0  }
   0xe   : > { %120 = sbr.rel (%p117_p9) target bundleno = 442 (0x1ba), region = 28  ;;  %1017 = vset.pattern.permute.xlu1 (!%p117_p9), %v1082_v3  ;;  %1016 = vset.pattern.permute.xlu0 (!%p117_p9), %v1082_v3  ;;  %p139_p10 = scmp.lt.s32.totalorder (!%p117_p9), %s725_s21, 127  ;;  %v925_v4 = vpack.c.bf16 (!%p117_p9), %v372_v1, %v371_v0  ;;  %v374_v5 = vld [vmem:[%s1392_s1 + $0x18] sm:$0xff] (!%p117_p9)  ;;  %v375_v7 = vld [vmem:[%s1392_s1 + $0x20] sm:$0xff] (!%p117_p9)  ;;  %v376_v8 = vld [vmem:[%s1392_s1 + $0x28] sm:$0xff] (!%p117_p9) }
   0xf   : > { %v929_v6 = vpack.c.bf16 (!%p117_p9), %v374_v5, %v373_v2  ;;  %v933_v9 = vpack.c.bf16 (!%p117_p9), %v376_v8, %v375_v7  ;;  %v377_v10 = vld [vmem:[%s1392_s1 + $0x30] sm:$0xff] (!%p117_p9)  ;;  %v378_v13 = vld [vmem:[%s1392_s1 + $0x38] sm:$0xff] (!%p117_p9)  ;;  %v379_v17 = vld [vmem:[%s1392_s1 + $0x40] sm:$0xff] (!%p117_p9)  ;;  %v1236_v58 = vand.u32 (!%p117_p9), 127, %v145_v57  ;;  %s796_s23 = sshll.u32 (!%p117_p9), %s1123_s13, 12  ;;  %s1084_s29 = smov (!%p117_p9), [#allocation2]  }
  0x10   : > { %926 = vmatprep.subr.bf16.mxu0 (!%p117_p9), %v925_v4  ;;  %957 = vmatprep.subr.bf16.mxu1 (!%p117_p9), %v925_v4  ;;  %v937_v16 = vpack.c.bf16 (!%p117_p9), %v378_v13, %v377_v10  ;;  %v380_v18 = vld [vmem:[%s1392_s1 + $0x48] sm:$0xff] (!%p117_p9)  ;;  %v381_v22 = vld [vmem:[%s1392_s1 + $0x50] sm:$0xff] (!%p117_p9)  ;;  %v382_v23 = vld [vmem:[%s1392_s1 + $0x58] sm:$0xff] (!%p117_p9)  ;;  %s1340_s27 = scalar_lea.hbm (!%p117_p9), %s1393_s2, %s796_s23  ;;  %s1022_s30 = sshll.u32 (!%p117_p9), %s1084_s29, 4  ;;  %s1023_s30 = int_to_ptr.vmem [resolvable:$false] %s1022_s30 }
  0x11   : > { %928 = vmatpush3.bf16.msra.mxu0 (!%p117_p9), %v925_v4  ;;  %965 = vmatpush3.bf16.msra.mxu1 (!%p117_p9), %v925_v4  ;;  %v941_v21 = vpack.c.bf16 (!%p117_p9), %v380_v18, %v379_v17  ;;  %v945_v26 = vpack.c.bf16 (!%p117_p9), %v382_v23, %v381_v22  ;;  %v383_v27 = vld [vmem:[%s1392_s1 + $0x60] sm:$0xff] (!%p117_p9)  ;;  %v384_v28 = vld [vmem:[%s1392_s1 + $0x68] sm:$0xff] (!%p117_p9)  ;;  %v385_v32 = vld [vmem:[%s1392_s1 + $0x70] sm:$0xff] (!%p117_p9)  ;;  %s1024_s3 = scalar_lea.vmem (!%p117_p9), %s1023_s30, 8192 }
  0x12   : > { %930 = vmatprep.subr.bf16.mxu0 (!%p117_p9), %v929_v6  ;;  %958 = vmatprep.subr.bf16.mxu1 (!%p117_p9), %v929_v6  ;;  %v949_v31 = vpack.c.bf16 (!%p117_p9), %v384_v28, %v383_v27  ;;  %v386_v33 = vld [vmem:[%s1392_s1 + $0x78] sm:$0xff] (!%p117_p9) }
  0x13   : > { %v953_v36 = vpack.c.bf16 (!%p117_p9), %v386_v33, %v385_v32 }
  0x15   : > { %s1401_s21 = smov (!%p139_p10, %s725_s21), 127  ;;  %932 = vmatpush3.bf16.msra.mxu0 %v929_v6  ;;  %966 = vmatpush3.bf16.msra.mxu1 %v929_v6 }
  0x16   : > { %s726_s6 = sshll.u32 %s1401_s21, 3  ;;  %934 = vmatprep.subr.bf16.mxu0 %v933_v9  ;;  %959 = vmatprep.subr.bf16.mxu1 %v933_v9 }
  0x17   : > { %s1172_s14 = scalar_lea.vmem %s1391_s0, %s726_s6 }
  0x18   : > { %v148_v11 = vld [vmem:[%s1172_s14 + $0x8] sm:$0xff]  ;;  %v147_v12 = vld [vmem:[%s1172_s14] sm:$0xff]  ;;  %v165_v19 = vld [vmem:[%s1172_s14 + $0x90] sm:$0xff] }
  0x19   : > { %183 = vperm.xlu1 %1017, %v148_v11   ;;  %180 = vperm.xlu0 %1016, %v147_v12   ;;  %v164_v14 = vld [vmem:[%s1172_s14 + $0x88] sm:$0xff]  ;;  %v163_v15 = vld [vmem:[%s1172_s14 + $0x80] sm:$0xff]  ;;  %v149_v20 = vld [vmem:[%s1172_s14 + $0x10] sm:$0xff] }
  0x1a   : > { %936 = vmatpush3.bf16.msra.mxu0 %v933_v9  ;;  %967 = vmatpush3.bf16.msra.mxu1 %v933_v9  ;;  %v166_v24 = vld [vmem:[%s1172_s14 + $0x98] sm:$0xff]  ;;  %v167_v29 = vld [vmem:[%s1172_s14 + $0xa0] sm:$0xff]  ;;  %v168_v34 = vld [vmem:[%s1172_s14 + $0xa8] sm:$0xff] }
  0x1b   : > { %938 = vmatprep.subr.bf16.mxu0 %v937_v16  ;;  %960 = vmatprep.subr.bf16.mxu1 %v937_v16  ;;  %v150_v25 = vld [vmem:[%s1172_s14 + $0x18] sm:$0xff]  ;;  %v151_v30 = vld [vmem:[%s1172_s14 + $0x20] sm:$0xff]  ;;  %v152_v35 = vld [vmem:[%s1172_s14 + $0x28] sm:$0xff] }
  0x1c   : > { %v169_v37 = vld [vmem:[%s1172_s14 + $0xb0] sm:$0xff]  ;;  %v170_v39 = vld [vmem:[%s1172_s14 + $0xb8] sm:$0xff]  ;;  %v171_v41 = vld [vmem:[%s1172_s14 + $0xc0] sm:$0xff] }
  0x1d   : > { %231 = vperm.xlu1 %1017, %v164_v14   ;;  %228 = vperm.xlu0 %1016, %v163_v15   ;;  %v153_v38 = vld [vmem:[%s1172_s14 + $0x30] sm:$0xff]  ;;  %v154_v40 = vld [vmem:[%s1172_s14 + $0x38] sm:$0xff]  ;;  %v155_v42 = vld [vmem:[%s1172_s14 + $0x40] sm:$0xff] }
  0x1e   : > { %940 = vmatpush3.bf16.msra.mxu0 %v937_v16  ;;  %968 = vmatpush3.bf16.msra.mxu1 %v937_v16  ;;  %v172_v43 = vld [vmem:[%s1172_s14 + $0xc8] sm:$0xff]  ;;  %v173_v45 = vld [vmem:[%s1172_s14 + $0xd0] sm:$0xff]  ;;  %v174_v47 = vld [vmem:[%s1172_s14 + $0xd8] sm:$0xff] }
  0x1f   : > { %942 = vmatprep.subr.bf16.mxu0 %v941_v21  ;;  %961 = vmatprep.subr.bf16.mxu1 %v941_v21  ;;  %v156_v44 = vld [vmem:[%s1172_s14 + $0x48] sm:$0xff]  ;;  %v157_v46 = vld [vmem:[%s1172_s14 + $0x50] sm:$0xff]  ;;  %v158_v48 = vld [vmem:[%s1172_s14 + $0x58] sm:$0xff] }
  0x20   : > { %v175_v49 = vld [vmem:[%s1172_s14 + $0xe0] sm:$0xff]  ;;  %v176_v51 = vld [vmem:[%s1172_s14 + $0xe8] sm:$0xff]  ;;  %v177_v53 = vld [vmem:[%s1172_s14 + $0xf0] sm:$0xff] }
  0x21   : > { %234 = vperm.xlu1 %1017, %v165_v19   ;;  %186 = vperm.xlu0 %1016, %v149_v20   ;;  %v159_v50 = vld [vmem:[%s1172_s14 + $0x60] sm:$0xff]  ;;  %v160_v52 = vld [vmem:[%s1172_s14 + $0x68] sm:$0xff]  ;;  %v161_v54 = vld [vmem:[%s1172_s14 + $0x70] sm:$0xff] }
  0x22   : > { %944 = vmatpush3.bf16.msra.mxu0 %v941_v21  ;;  %969 = vmatpush3.bf16.msra.mxu1 %v941_v21  ;;  %v178_v55 = vld [vmem:[%s1172_s14 + $0xf8] sm:$0xff] }
  0x23   : > { %946 = vmatprep.subr.bf16.mxu0 %v945_v26  ;;  %962 = vmatprep.subr.bf16.mxu1 %v945_v26  ;;  %v162_v56 = vld [vmem:[%s1172_s14 + $0x78] sm:$0xff]  ;;  %s135_s14 = sand.u32 1, %s1072_s10  }
  0x24   : > { %s724_s21 = sshll.u32 %s135_s14, 8  ;;  %s1350_s13 = scalar_lea.sflag [#allocation3], %s135_s14 }
  0x25   : > { %237 = vperm.xlu1 %1017, %v166_v24   ;;  %189 = vperm.xlu0 %1016, %v150_v25   ;;  %s1305_s22 = scalar_lea.vmem [#allocation2], %s724_s21 }
  0x26   : > { %948 = vmatpush3.bf16.msra.mxu0 %v945_v26  ;;  %970 = vmatpush3.bf16.msra.mxu1 %v945_v26  ;;  %s658_s24 = sshll.u32 %s1305_s22, 4  ;;  %s1342_s24 = int_to_ptr.vmem [resolvable:$true] %s658_s24 }
  0x27   : > { %950 = vmatprep.subr.bf16.mxu0 %v949_v31  ;;  %963 = vmatprep.subr.bf16.mxu1 %v949_v31  ;;  %s1018_s28 = scalar_lea.vmem %s1342_s24, 4096  ;;  %p1025_p0 = scmp.lt.s32.totalorder %s1342_s24, %s1023_s30 }
  0x28   : > { %p1019_p11 = scmp.ne.s32.totalorder %s1342_s24, %s1018_s28  ;;  %p1026_p1 = scmp.lt.s32.totalorder %s1024_s3, %s1018_s28 }
  0x29   : > { %240 = vperm.xlu1 %1017, %v167_v29   ;;  %192 = vperm.xlu0 %1016, %v151_v30  }
  0x2a   : > { %952 = vmatpush3.bf16.msra.mxu0 %v949_v31  ;;  %971 = vmatpush3.bf16.msra.mxu1 %v949_v31  ;;  %p1020_p12 = pnand %p1019_p11, %p1140_p5  ;;  %p1027_p2 = por %p1026_p1, %p1025_p0 }
  0x2b   : > { %954 = vmatprep.subr.bf16.mxu0 %v953_v36  ;;  %964 = vmatprep.subr.bf16.mxu1 %v953_v36 }
  0x2c   : > { %p1021_p13 = pneg %p1020_p12 }
  0x2d   : > { %243 = vperm.xlu1 %1017, %v168_v34   ;;  %195 = vperm.xlu0 %1016, %v152_v35  }
  0x2e   : > { %956 = vmatpush3.bf16.msra.mxu0 %v953_v36  ;;  %972 = vmatpush3.bf16.msra.mxu1 %v953_v36  ;;  %p1028_p3 = pnand %p1027_p2, %p1021_p13 }
  0x31   : > { %246 = vperm.xlu1 %1017, %v169_v37   ;;  %198 = vperm.xlu0 %1016, %v153_v38  }
  0x35   : > { %249 = vperm.xlu1 %1017, %v170_v39   ;;  %201 = vperm.xlu0 %1016, %v154_v40  }
  0x39   : > { %252 = vperm.xlu1 %1017, %v171_v41   ;;  %204 = vperm.xlu0 %1016, %v155_v42  }
  0x3d   : > { %255 = vperm.xlu1 %1017, %v172_v43   ;;  %207 = vperm.xlu0 %1016, %v156_v44  }
  0x41   : > { %258 = vperm.xlu1 %1017, %v173_v45   ;;  %210 = vperm.xlu0 %1016, %v157_v46  }
  0x45   : > { %261 = vperm.xlu1 %1017, %v174_v47   ;;  %213 = vperm.xlu0 %1016, %v158_v48  }
  0x49   : > { %264 = vperm.xlu1 %1017, %v175_v49   ;;  %216 = vperm.xlu0 %1016, %v159_v50  }
  0x4d   : > { %267 = vperm.xlu1 %1017, %v176_v51   ;;  %219 = vperm.xlu0 %1016, %v160_v52  }
  0x51   : > { %270 = vperm.xlu1 %1017, %v177_v53   ;;  %222 = vperm.xlu0 %1016, %v161_v54  }
  0x55   : > { %273 = vperm.xlu1 %1017, %v178_v55   ;;  %225 = vperm.xlu0 %1016, %v162_v56  }
  0x98   : > { %v184_v59 = vpop.permute.xlu1 %183  ;;  %v181_v60 = vpop.permute.xlu0 %180 }
  0x99   : > { %vm276_vm0 = vcmp.eq.s32.totalorder %v184_v59, %v1236_v58  ;;  %vm275_vm1 = vcmp.eq.s32.totalorder %v181_v60, %v1236_v58 }
  0x9a   : > { %877 = vmatprep.mubr.msk.f32.mxu0 %vm275_vm1, %v1083_v61 }
  0x9b   : > { %878 = vmatmul.mubr.msk.f32.vlgmr.msra.gmra.mrb[0].mxu0 %vm276_vm0, %v1083_v61 }
  0x9c   : > { %v232_v62 = vpop.permute.xlu1 %231  ;;  %v229_v63 = vpop.permute.xlu0 %228 }
  0x9d   : > { %vm292_vm2 = vcmp.eq.s32.totalorder %v232_v62, %v1236_v58  ;;  %vm291_vm3 = vcmp.eq.s32.totalorder %v229_v63, %v1236_v58 }
  0x9e   : > { %901 = vmatprep.mubr.msk.f32.mxu1 %vm291_vm3, %v1083_v61 }
  0x9f   : > { %902 = vmatmul.mubr.msk.f32.vlgmr.msra.gmra.mrb[0].mxu1 %vm292_vm2, %v1083_v61 }
  0xa0   : > { %v235_v0 = vpop.permute.xlu1 %234  ;;  %v187_v1 = vpop.permute.xlu0 %186 }
  0xa1   : > { %vm293_vm4 = vcmp.eq.s32.totalorder %v235_v0, %v1236_v58  ;;  %vm277_vm5 = vcmp.eq.s32.totalorder %v187_v1, %v1236_v58 }
  0xa2   : > { %880 = vmatprep.mubr.msk.f32.mxu0 %vm277_vm5, %v1083_v61  ;;  %904 = vmatprep.mubr.msk.f32.mxu1 %vm293_vm4, %v1083_v61 }
  0xa4   : > { %v238_v2 = vpop.permute.xlu1 %237  ;;  %v190_v3 = vpop.permute.xlu0 %189 }
  0xa5   : > { %vm294_vm6 = vcmp.eq.s32.totalorder %v238_v2, %v1236_v58  ;;  %vm278_vm7 = vcmp.eq.s32.totalorder %v190_v3, %v1236_v58 }
  0xa6   : > { %881 = vmatmul.mubr.msk.f32.gmra.mrb[2].mxu0 %vm278_vm7, %v1083_v61  ;;  %905 = vmatmul.mubr.msk.f32.gmra.mrb[2].mxu1 %vm294_vm6, %v1083_v61 }
  0xa8   : > { %v241_v4 = vpop.permute.xlu1 %240  ;;  %v193_v5 = vpop.permute.xlu0 %192 }
  0xa9   : > { %vm295_vm8 = vcmp.eq.s32.totalorder %v241_v4, %v1236_v58  ;;  %vm279_vm9 = vcmp.eq.s32.totalorder %v193_v5, %v1236_v58 }
  0xaa   : > { %883 = vmatprep.mubr.msk.f32.mxu0 %vm279_vm9, %v1083_v61  ;;  %907 = vmatprep.mubr.msk.f32.mxu1 %vm295_vm8, %v1083_v61 }
  0xac   : > { %v244_v6 = vpop.permute.xlu1 %243  ;;  %v196_v7 = vpop.permute.xlu0 %195 }
  0xad   : > { %vm296_vm10 = vcmp.eq.s32.totalorder %v244_v6, %v1236_v58  ;;  %vm280_vm11 = vcmp.eq.s32.totalorder %v196_v7, %v1236_v58 }
  0xae   : > { %884 = vmatmul.mubr.msk.f32.gmra.mrb[4].mxu0 %vm280_vm11, %v1083_v61  ;;  %908 = vmatmul.mubr.msk.f32.gmra.mrb[4].mxu1 %vm296_vm10, %v1083_v61 }
  0xb0   : > { %v247_v8 = vpop.permute.xlu1 %246  ;;  %v199_v9 = vpop.permute.xlu0 %198 }
  0xb1   : > { %vm297_vm12 = vcmp.eq.s32.totalorder %v247_v8, %v1236_v58  ;;  %vm281_vm13 = vcmp.eq.s32.totalorder %v199_v9, %v1236_v58 }
  0xb2   : > { %886 = vmatprep.mubr.msk.f32.mxu0 %vm281_vm13, %v1083_v61  ;;  %910 = vmatprep.mubr.msk.f32.mxu1 %vm297_vm12, %v1083_v61 }
  0xb4   : > { %v250_v10 = vpop.permute.xlu1 %249  ;;  %v202_v11 = vpop.permute.xlu0 %201 }
  0xb5   : > { %vm298_vm14 = vcmp.eq.s32.totalorder %v250_v10, %v1236_v58  ;;  %vm282_vm15 = vcmp.eq.s32.totalorder %v202_v11, %v1236_v58 }
  0xb6   : > { %887 = vmatmul.mubr.msk.f32.gmra.mrb[6].mxu0 %vm282_vm15, %v1083_v61  ;;  %911 = vmatmul.mubr.msk.f32.gmra.mrb[6].mxu1 %vm298_vm14, %v1083_v61 }
  0xb8   : > { %v253_v12 = vpop.permute.xlu1 %252  ;;  %v205_v13 = vpop.permute.xlu0 %204 }
  0xb9   : > { %vm299_vm0 = vcmp.eq.s32.totalorder %v253_v12, %v1236_v58  ;;  %vm283_vm1 = vcmp.eq.s32.totalorder %v205_v13, %v1236_v58 }
  0xba   : > { %889 = vmatprep.mubr.msk.f32.mxu0 %vm283_vm1, %v1083_v61  ;;  %913 = vmatprep.mubr.msk.f32.mxu1 %vm299_vm0, %v1083_v61 }
  0xbc   : > { %v256_v14 = vpop.permute.xlu1 %255  ;;  %v208_v15 = vpop.permute.xlu0 %207 }
  0xbd   : > { %vm300_vm2 = vcmp.eq.s32.totalorder %v256_v14, %v1236_v58  ;;  %vm284_vm3 = vcmp.eq.s32.totalorder %v208_v15, %v1236_v58 }
  0xbe   : > { %890 = vmatmul.mubr.msk.f32.gmra.mrb[8].mxu0 %vm284_vm3, %v1083_v61  ;;  %914 = vmatmul.mubr.msk.f32.gmra.mrb[8].mxu1 %vm300_vm2, %v1083_v61 }
  0xc0   : > { %v259_v16 = vpop.permute.xlu1 %258  ;;  %v211_v17 = vpop.permute.xlu0 %210 }
  0xc1   : > { %vm301_vm4 = vcmp.eq.s32.totalorder %v259_v16, %v1236_v58  ;;  %vm285_vm5 = vcmp.eq.s32.totalorder %v211_v17, %v1236_v58 }
  0xc2   : > { %892 = vmatprep.mubr.msk.f32.mxu0 %vm285_vm5, %v1083_v61  ;;  %916 = vmatprep.mubr.msk.f32.mxu1 %vm301_vm4, %v1083_v61 }
  0xc4   : > { %v262_v18 = vpop.permute.xlu1 %261  ;;  %v214_v19 = vpop.permute.xlu0 %213 }
  0xc5   : > { %vm302_vm6 = vcmp.eq.s32.totalorder %v262_v18, %v1236_v58  ;;  %vm286_vm7 = vcmp.eq.s32.totalorder %v214_v19, %v1236_v58 }
  0xc6   : > { %893 = vmatmul.mubr.msk.f32.gmra.mrb[10].mxu0 %vm286_vm7, %v1083_v61  ;;  %917 = vmatmul.mubr.msk.f32.gmra.mrb[10].mxu1 %vm302_vm6, %v1083_v61 }
  0xc8   : > { %v265_v20 = vpop.permute.xlu1 %264  ;;  %v217_v21 = vpop.permute.xlu0 %216 }
  0xc9   : > { %vm303_vm8 = vcmp.eq.s32.totalorder %v265_v20, %v1236_v58  ;;  %vm287_vm9 = vcmp.eq.s32.totalorder %v217_v21, %v1236_v58 }
  0xca   : > { %895 = vmatprep.mubr.msk.f32.mxu0 %vm287_vm9, %v1083_v61  ;;  %919 = vmatprep.mubr.msk.f32.mxu1 %vm303_vm8, %v1083_v61 }
  0xcc   : > { %v268_v22 = vpop.permute.xlu1 %267  ;;  %v220_v23 = vpop.permute.xlu0 %219 }
  0xcd   : > { %vm304_vm10 = vcmp.eq.s32.totalorder %v268_v22, %v1236_v58  ;;  %vm288_vm11 = vcmp.eq.s32.totalorder %v220_v23, %v1236_v58 }
  0xce   : > { %896 = vmatmul.mubr.msk.f32.gmra.mrb[12].mxu0 %vm288_vm11, %v1083_v61  ;;  %920 = vmatmul.mubr.msk.f32.gmra.mrb[12].mxu1 %vm304_vm10, %v1083_v61 }
  0xd0   : > { %v271_v24 = vpop.permute.xlu1 %270  ;;  %v223_v25 = vpop.permute.xlu0 %222 }
  0xd1   : > { %vm305_vm12 = vcmp.eq.s32.totalorder %v271_v24, %v1236_v58  ;;  %vm289_vm13 = vcmp.eq.s32.totalorder %v223_v25, %v1236_v58 }
  0xd2   : > { %898 = vmatprep.mubr.msk.f32.mxu0 %vm289_vm13, %v1083_v61  ;;  %922 = vmatprep.mubr.msk.f32.mxu1 %vm305_vm12, %v1083_v61 }
  0xd4   : > { %v274_v26 = vpop.permute.xlu1 %273  ;;  %v226_v27 = vpop.permute.xlu0 %225 }
  0xd5   : > { %vm306_vm14 = vcmp.eq.s32.totalorder %v274_v26, %v1236_v58  ;;  %vm290_vm15 = vcmp.eq.s32.totalorder %v226_v27, %v1236_v58 }
  0xd6   : > { %899 = vmatmul.mubr.msk.f32.gmra.mrb[14].mxu0 %vm290_vm15, %v1083_v61  ;;  %923 = vmatmul.mubr.msk.f32.gmra.mrb[14].mxu1 %vm306_vm14, %v1083_v61 }
 0x16e   : > { %v879_v28 = vpop.f32.mrb[0].mxu0 }
 0x16f   : > { %613 = vst [vmem:[%s1305_s22 + $0x8] sm:$0xff] %v879_v28  ;;  %v453_v29 = vpop.f32.mrb[1].mxu0 }
 0x170   : > { %612 = vst [vmem:[%s1305_s22] sm:$0xff] %v453_v29 }
 0x172   : > { %v903_v30 = vpop.f32.mrb[0].mxu1 }
 0x173   : > { %629 = vst [vmem:[%s1305_s22 + $0x88] sm:$0xff] %v903_v30  ;;  %v533_v31 = vpop.f32.mrb[1].mxu1 }
 0x174   : > { %628 = vst [vmem:[%s1305_s22 + $0x80] sm:$0xff] %v533_v31 }
 0x179   : > { %v882_v32 = vpop.f32.mrb[2].mxu0  ;;  %v906_v33 = vpop.f32.mrb[2].mxu1 }
 0x17a   : > { %615 = vst [vmem:[%s1305_s22 + $0x18] sm:$0xff] %v882_v32  ;;  %631 = vst [vmem:[%s1305_s22 + $0x98] sm:$0xff] %v906_v33  ;;  %v463_v34 = vpop.f32.mrb[3].mxu0  ;;  %v543_v35 = vpop.f32.mrb[3].mxu1 }
 0x17b   : > { %614 = vst [vmem:[%s1305_s22 + $0x10] sm:$0xff] %v463_v34  ;;  %630 = vst [vmem:[%s1305_s22 + $0x90] sm:$0xff] %v543_v35 }
 0x181   : > { %v885_v36 = vpop.f32.mrb[4].mxu0  ;;  %v909_v37 = vpop.f32.mrb[4].mxu1 }
 0x182   : > { %617 = vst [vmem:[%s1305_s22 + $0x28] sm:$0xff] %v885_v36  ;;  %633 = vst [vmem:[%s1305_s22 + $0xa8] sm:$0xff] %v909_v37  ;;  %v473_v38 = vpop.f32.mrb[5].mxu0  ;;  %v553_v39 = vpop.f32.mrb[5].mxu1 }
 0x183   : > { %616 = vst [vmem:[%s1305_s22 + $0x20] sm:$0xff] %v473_v38  ;;  %632 = vst [vmem:[%s1305_s22 + $0xa0] sm:$0xff] %v553_v39 }
 0x189   : > { %v888_v40 = vpop.f32.mrb[6].mxu0  ;;  %v912_v41 = vpop.f32.mrb[6].mxu1 }
 0x18a   : > { %619 = vst [vmem:[%s1305_s22 + $0x38] sm:$0xff] %v888_v40  ;;  %635 = vst [vmem:[%s1305_s22 + $0xb8] sm:$0xff] %v912_v41  ;;  %v483_v42 = vpop.f32.mrb[7].mxu0  ;;  %v563_v43 = vpop.f32.mrb[7].mxu1 }
 0x18b   : > { %618 = vst [vmem:[%s1305_s22 + $0x30] sm:$0xff] %v483_v42  ;;  %634 = vst [vmem:[%s1305_s22 + $0xb0] sm:$0xff] %v563_v43 }
 0x191   : > { %v891_v44 = vpop.f32.mrb[8].mxu0  ;;  %v915_v45 = vpop.f32.mrb[8].mxu1 }
 0x192   : > { %621 = vst [vmem:[%s1305_s22 + $0x48] sm:$0xff] %v891_v44  ;;  %637 = vst [vmem:[%s1305_s22 + $0xc8] sm:$0xff] %v915_v45  ;;  %v493_v46 = vpop.f32.mrb[9].mxu0  ;;  %v573_v47 = vpop.f32.mrb[9].mxu1 }
 0x193   : > { %620 = vst [vmem:[%s1305_s22 + $0x40] sm:$0xff] %v493_v46  ;;  %636 = vst [vmem:[%s1305_s22 + $0xc0] sm:$0xff] %v573_v47 }
 0x199   : > { %v894_v48 = vpop.f32.mrb[10].mxu0  ;;  %v918_v49 = vpop.f32.mrb[10].mxu1 }
 0x19a   : > { %623 = vst [vmem:[%s1305_s22 + $0x58] sm:$0xff] %v894_v48  ;;  %639 = vst [vmem:[%s1305_s22 + $0xd8] sm:$0xff] %v918_v49  ;;  %v503_v50 = vpop.f32.mrb[11].mxu0  ;;  %v583_v51 = vpop.f32.mrb[11].mxu1 }
 0x19b   : > { %622 = vst [vmem:[%s1305_s22 + $0x50] sm:$0xff] %v503_v50  ;;  %638 = vst [vmem:[%s1305_s22 + $0xd0] sm:$0xff] %v583_v51 }
 0x1a1   : > { %v897_v52 = vpop.f32.mrb[12].mxu0  ;;  %v921_v53 = vpop.f32.mrb[12].mxu1 }
 0x1a2   : > { %625 = vst [vmem:[%s1305_s22 + $0x68] sm:$0xff] %v897_v52  ;;  %641 = vst [vmem:[%s1305_s22 + $0xe8] sm:$0xff] %v921_v53  ;;  %v513_v54 = vpop.f32.mrb[13].mxu0  ;;  %v593_v55 = vpop.f32.mrb[13].mxu1 }
 0x1a3   : > { %624 = vst [vmem:[%s1305_s22 + $0x60] sm:$0xff] %v513_v54  ;;  %640 = vst [vmem:[%s1305_s22 + $0xe0] sm:$0xff] %v593_v55 }
 0x1a9   : > { %v900_v56 = vpop.f32.mrb[14].mxu0  ;;  %v924_v57 = vpop.f32.mrb[14].mxu1 }
 0x1aa   : > { %627 = vst [vmem:[%s1305_s22 + $0x78] sm:$0xff] %v900_v56  ;;  %643 = vst [vmem:[%s1305_s22 + $0xf8] sm:$0xff] %v924_v57  ;;  %v523_v58 = vpop.f32.mrb[15].mxu0  ;;  %v603_v59 = vpop.f32.mrb[15].mxu1 }
 0x1ab   : > { %626 = vst [vmem:[%s1305_s22 + $0x70] sm:$0xff] %v523_v58  ;;  %642 = vst [vmem:[%s1305_s22 + $0xf0] sm:$0xff] %v603_v59 }
 0x1ac   : > { %1031 = shalt.err (!%p1028_p3)
}
 0x1ad   : > { %s1032_s4 = scalar_lea.hbm %s1340_s27, 4096  ;;  %s1036_s7 = scalar_lea.hbm %s1393_s2, 16384 }
 0x1ae   : > { %p1033_p4 = scmp.ne.s32.totalorder %s1340_s27, %s1032_s4  ;;  %p1037_p9 = scmp.lt.u32.totalorder %s1340_s27, %s1393_s2 }
 0x1af   : > { %p1038_p10 = scmp.lt.u32.totalorder %s1036_s7, %s1032_s4  ;;  %p1040_p12 = scmp.lt.u32.totalorder %s1032_s4, %s1340_s27 }
 0x1b0   : > { %p1034_p7 = pnand %p1033_p4, %p1140_p5 }
 0x1b1   : > { %p1039_p11 = por %p1038_p10, %p1037_p9 }
 0x1b2   : > { %p1035_p8 = pneg %p1034_p7 }
 0x1b3   : > { %p1041_p13 = por %p1040_p12, %p1039_p11 }
 0x1b5   : > { %p1042_p0 = pnand %p1041_p13, %p1035_p8 }
 0x1b7   : > { %1045 = shalt.err (!%p1042_p0)
}
 0x1b8   : > { %s1085_s17 = smov 128   ;;  %s1086_s14 = smov 8  }
 0x1b9   : > { %973 = dma.vmem_to_hbm [thread:$0]  (%p1140_p5), %s1342_s24, 4096, %s1340_s27, %s1350_s13, %s1085_s17, %s1085_s17, %s1086_s14  }
 0x1ba PF: > { %p979_p1 = scmp.ge.s32.totalorder %s1080_s12, 2  ;;  %s673_s21 = sand.u32 1, %s1068_s9  }
 0x1bb   : > { %s674_s22 = scalar_lea.sflag [#allocation3], %s673_s21 }
 0x1bc   : > { %p976_p2 = pnand %p979_p1, %p1144_p6 }
 0x1be   : > { %1063 = dma.done.wait (!%p976_p2), %s674_s22, 4096  }
 0x1bf   : > { %1065 = vsyncadd (!%p976_p2), %s674_s22, 4294963200  ;;  %p12_p3 = scmp.ge.s32.totalorder %s1127_s15, 6   ;;  %s1396_s9 = smov %s1072_s10 }
 0x1c0   : > { %s1397_s10 = smov %s1076_s11  ;;  %s1398_s11 = smov %s1138_s18 }
 0x1c1   : > { %s1399_s12 = smov %s1127_s15  ;;  %14 = sbr.rel (!%p12_p3) target bundleno = 3 (0x3), region = 63 }
 0x1c8   :  { %679 = vsyncpa [#allocation3], 1 }
 0x1c9   :  { %681 = vsyncpa [#allocation3 + $0x1], 1 }

</bundles_post_ra>
